<compile_context>
chip_gen: v6e
topology: v6e:2x2x1
jax: 0.10.0
libtpu: 0.0.40
codegen_flags: <defaults>
</compile_context>

<pallas_src>
import functools

import jax
import jax.numpy as jnp
from jax.experimental import pallas as pl
from jax.experimental.pallas import tpu as pltpu


# ---------------------------------------------------------------------------
# Helpers
# ---------------------------------------------------------------------------

def _log_softmax(logits):
    m = jnp.max(logits, axis=-1, keepdims=True)
    sh = logits - m
    lse = jnp.log(jnp.sum(jnp.exp(sh), axis=-1, keepdims=True))
    return sh - lse


# ---------------------------------------------------------------------------
# Kernels
# ---------------------------------------------------------------------------

def _rnn_step_kernel(cat_ref, inp_ref, hid_ref, w_all_ref, b_all_ref,
                     out_ref, hid_out_ref, comb_scr, *, c_sz, i_sz, h_sz):
    """Single-step forward.  `combined` is assembled in a VMEM scratch (no HBM
    round trip for the concat) and ONE fused MXU matmul gives [hidden'|logits]."""
    comb_scr[:, :c_sz] = cat_ref[...]
    comb_scr[:, c_sz:c_sz + i_sz] = inp_ref[...]
    comb_scr[:, c_sz + i_sz:] = hid_ref[...]
    z = (jnp.dot(comb_scr[...].astype(w_all_ref.dtype), w_all_ref[...],
                 preferred_element_type=jnp.float32)
         + b_all_ref[...])
    # TODO(synk): nn.Dropout(0.1) in training mode (PyTorch RNG mask + 1/0.9
    # scale) is not reproducible against torch RNG; eval-mode identity used.
    out_ref[...] = _log_softmax(z[:, h_sz:])
    hid_out_ref[...] = z[:, :h_sz]


def _input_proj_kernel(catinp_ref, w_ref, b_ref, zin_ref):
    """Batched non-recurrent input projection: Zin = catinp @ W_ih[:CI] + b_ih."""
    tb, bb, ci = catinp_ref.shape
    # (tb, bb, ci) -> (tb*bb, ci): layout-preserving for f32 when bb % 8 == 0.
    x = catinp_ref[...].reshape(tb * bb, ci).astype(w_ref.dtype)
    z = jnp.dot(x, w_ref[...], preferred_element_type=jnp.float32) + b_ref[...]
    zin_ref[...] = z.reshape(tb, bb, -1)


def _recurrence_kernel(zin_ref, h0_ref, w_hh_ref, hprev_ref, hfinal_ref, *, t_blk):
    """Serial part only:  h_t = Zin_t + h_{t-1} @ W_hh.

    grid = (batch_blocks ["parallel"], time_blocks ["arbitrary"]).  The hidden
    carry is the resident `hfinal_ref` output block itself (constant block
    index over the time axis) -- no scratch buffer, single final writeback.
    """
    t = pl.program_id(1)

    @pl.when(t == 0)
    def _():
        hfinal_ref[...] = h0_ref[...]

    w_hh = w_hh_ref[...]
    h = hfinal_ref[...]
    # Statically unrolled (t_blk is a compile-time constant); all indices static.
    for i in range(t_blk):
        hprev_ref[i] = h                      # h_{t-1}, consumed by the post-pass
        h = zin_ref[i] + jnp.dot(h.astype(w_hh.dtype), w_hh,
                                 preferred_element_type=jnp.float32)
    hfinal_ref[...] = h


def _logits_softmax_kernel(catinp_ref, hprev_ref, wf_ci_ref, wf_h_ref, b_ref,
                           out_ref):
    """Post-pass (off the serial chain):
    logits = [catinp | h_prev] @ W_fold + b_fold, then log_softmax, batched over
    t_blk*B rows.  The full (T,B,O) output block is resident -> one writeback."""
    i = pl.program_id(0)
    tb, bb, ci = catinp_ref.shape
    x = catinp_ref[...].reshape(tb * bb, ci).astype(wf_ci_ref.dtype)
    hp = hprev_ref[...].reshape(tb * bb, hprev_ref.shape[-1]).astype(wf_h_ref.dtype)
    logits = (jnp.dot(x, wf_ci_ref[...], preferred_element_type=jnp.float32)
              + jnp.dot(hp, wf_h_ref[...], preferred_element_type=jnp.float32)
              + b_ref[...])
    vals = _log_softmax(logits).reshape(tb, bb, -1)
    out_ref[pl.ds(pl.multiple_of(i * tb, tb), tb)] = vals


# ---------------------------------------------------------------------------
# Parameter preparation (done ONCE, outside the per-step call path)
# ---------------------------------------------------------------------------

def prepare_params(params, category_size, input_size, hidden_size,
                   compute_dtype=jnp.float32):
    """Transpose, fuse i2h|i2o, fold o2o algebraically (in f32), split weights
    for the sequence kernels, pack biases.  `compute_dtype=jnp.bfloat16` halves
    resident-weight VMEM/DMA bytes; matmuls still accumulate in f32."""
    C, I, H = category_size, input_size, hidden_size
    O = params["i2o_w"].shape[0]
    CI = C + I
    f32 = jnp.float32
    cd = compute_dtype

    w_i2h_t = params["i2h_w"].T.astype(f32)                 # (C+I+H, H)
    w_i2o_t = params["i2o_w"].T.astype(f32)                 # (C+I+H, O)
    w_o2o_t = params["o2o_w"].T.astype(f32)                 # (H+O, O)
    b_i2h = params["i2h_b"].astype(f32)
    b_i2o = params["i2o_b"].astype(f32)
    b_o2o = params["o2o_b"].astype(f32)

    # logits = cat(hidden', output1) @ w_o2o_t + b_o2o
    #        = combined @ (w_fused @ w_o2o_t) + (b_fused @ w_o2o_t + b_o2o)
    w_fused = jnp.concatenate([w_i2h_t, w_i2o_t], axis=1)   # (C+I+H, H+O)
    b_fused = jnp.concatenate([b_i2h, b_i2o])
    w_fold = w_fused @ w_o2o_t                               # fold done in f32
    b_fold = b_fused @ w_o2o_t + b_o2o

    w_all = jnp.concatenate([w_i2h_t, w_fold], axis=1)       # (C+I+H, H+O)
    b_all = jnp.concatenate([b_i2h, b_fold]).reshape(1, H + O)

    return {
        # single-step fused weights: combined @ w_all + b_all -> [hidden'|logits]
        "w_all": w_all.astype(cd),
        "b_all": b_all,                                       # f32
        # recurrence split: hidden' = catinp @ w_ih_ci + h_prev @ w_ih_h + b_ih
        "w_ih_ci": w_i2h_t[:CI].astype(cd),                   # (C+I, H)
        "w_ih_h": w_i2h_t[CI:].astype(cd),                    # (H, H)
        "b_ih": b_i2h.reshape(1, H),                          # f32
        # folded logits: logits = catinp @ w_fold_ci + h_prev @ w_fold_h + b_fold
        "w_fold_ci": w_fold[:CI].astype(cd),                  # (C+I, O)
        "w_fold_h": w_fold[CI:].astype(cd),                   # (H, O)
        "b_fold": b_fold.reshape(1, O),                       # f32
        "C": C, "I": I, "H": H, "O": O, "dtype": cd,
    }


# ---------------------------------------------------------------------------
# Wrappers
# ---------------------------------------------------------------------------

def rnn_forward(category, inp, hidden, prepped):
    """Single-step forward, identical semantics to RNN.forward (eval mode)."""
    f32 = jnp.float32
    B = category.shape[0]
    C, I, H, O = prepped["C"], prepped["I"], prepped["H"], prepped["O"]
    vmem = pl.BlockSpec(memory_space=pltpu.MemorySpace.VMEM)
    # TODO(synk): for autoregressive generation, fold the whole sampling loop
    # into one pallas_call (as in rnn_forward_seq) or keep weights resident
    # across calls, instead of re-DMAing w_all/b_all every token.
    out, hid = pl.pallas_call(
        functools.partial(_rnn_step_kernel, c_sz=C, i_sz=I, h_sz=H),
        out_shape=(jax.ShapeDtypeStruct((B, O), f32),
                   jax.ShapeDtypeStruct((B, H), f32)),
        in_specs=[vmem] * 5,
        out_specs=(vmem, vmem),
        scratch_shapes=[pltpu.VMEM((B, C + I + H), f32)],
    )(category.astype(f32), inp.astype(f32), hidden.astype(f32),
      prepped["w_all"], prepped["b_all"])
    return out, hid


def rnn_forward_seq(category, inp_seq, hidden0, prepped, *, t_blk=8, b_blk=None):
    """Fused multi-timestep forward (teacher-forced inputs).

    category : (B, C)   fixed across timesteps (char-generation use case)
    inp_seq  : (T, B, I)
    hidden0  : (B, H)
    returns  : (T, B, O) log-softmax outputs, (B, H) final hidden state
    """
    f32 = jnp.float32
    T, B, _ = inp_seq.shape
    C, H, O = prepped["C"], prepped["H"], prepped["O"]
    CI = C + prepped["I"]
    b_blk = B if b_blk is None else b_blk
    assert T % t_blk == 0 and B % b_blk == 0
    assert b_blk % 8 == 0, "b_blk must be a sublane multiple"
    nt, nb = T // t_blk, B // b_blk

    # Concatenate the time-invariant category with per-step inputs once.
    catinp = jnp.concatenate(
        [jnp.broadcast_to(category.astype(f32)[None], (T, B, C)),
         inp_seq.astype(f32)], axis=2)                         # (T, B, C+I), f32

    def const(shape):
        return pl.BlockSpec(shape, lambda *_: (0,) * len(shape))

    # (1) Input projection for ALL timesteps: batched, pipelined, off the
    #     serial recurrence path.
    zin = pl.pallas_call(
        _input_proj_kernel,
        out_shape=jax.ShapeDtypeStruct((T, B, H), f32),
        grid=(nt,),
        in_specs=[pl.BlockSpec((t_blk, B, CI), lambda t: (t, 0, 0)),
                  const((CI, H)),
                  const((1, H))],
        out_specs=pl.BlockSpec((t_blk, B, H), lambda t: (t, 0, 0)),
        compiler_params=pltpu.CompilerParams(dimension_semantics=("parallel",)),
    )(catinp, prepped["w_ih_ci"], prepped["b_ih"])

    # (2) Minimal serial recurrence: h_t = Zin_t + h_{t-1} @ W_hh, T_BLK steps
    #     per grid step; hidden carry = resident hid_final output block.
    hprev_seq, hid_final = pl.pallas_call(
        functools.partial(_recurrence_kernel, t_blk=t_blk),
        out_shape=(jax.ShapeDtypeStruct((T, B, H), f32),
                   jax.ShapeDtypeStruct((B, H), f32)),
        grid=(nb, nt),
        in_specs=[pl.BlockSpec((t_blk, b_blk, H), lambda b, t: (t, b, 0)),
                  pl.BlockSpec((b_blk, H), lambda b, t: (b, 0)),
                  const((H, H))],
        out_specs=(pl.BlockSpec((t_blk, b_blk, H), lambda b, t: (t, b, 0)),
                   pl.BlockSpec((b_blk, H), lambda b, t: (b, 0))),
        compiler_params=pltpu.CompilerParams(
            dimension_semantics=("parallel", "arbitrary")),
    )(zin, hidden0.astype(f32), prepped["w_ih_h"])

    # (3) Logits + log_softmax, batched over t_blk*B rows, off the serial chain.
    #     Resident (T, B, O) output block -> one HBM writeback.
    out_seq = pl.pallas_call(
        _logits_softmax_kernel,
        out_shape=jax.ShapeDtypeStruct((T, B, O), f32),
        grid=(nt,),
        in_specs=[pl.BlockSpec((t_blk, B, CI), lambda t: (t, 0, 0)),
                  pl.BlockSpec((t_blk, B, H), lambda t: (t, 0, 0)),
                  const((CI, O)),
                  const((H, O)),
                  const((1, O))],
        out_specs=pl.BlockSpec((T, B, O), lambda t: (0, 0, 0)),
        compiler_params=pltpu.CompilerParams(dimension_semantics=("arbitrary",)),
    )(catinp, hprev_seq, prepped["w_fold_ci"], prepped["w_fold_h"],
      prepped["b_fold"])
    return out_seq, hid_final


# ---------------------------------------------------------------------------
# Pure-JAX reference (original un-fused formulation) + init
# ---------------------------------------------------------------------------

def _ref_forward(category, inp, hidden, params):
    combined = jnp.concatenate([category, inp, hidden], axis=1)
    h = combined @ params["i2h_w"].T + params["i2h_b"]
    o1 = combined @ params["i2o_w"].T + params["i2o_b"]
    logits = (jnp.concatenate([h, o1], axis=1) @ params["o2o_w"].T
              + params["o2o_b"])
    return jax.nn.log_softmax(logits, axis=1), h


def _init_params(key, category_size, input_size, hidden_size, output_size):
    """PyTorch-style uniform(-1/sqrt(fan_in), 1/sqrt(fan_in)) init."""
    def linear(key, out_f, in_f):
        kw, kb = jax.random.split(key)
        bound = 1.0 / (in_f ** 0.5)
        w = jax.random.uniform(kw, (out_f, in_f), jnp.float32, -bound, bound)
        b = jax.random.uniform(kb, (out_f,), jnp.float32, -bound, bound)
        return w, b

    k1, k2, k3 = jax.random.split(key, 3)
    comb = category_size + input_size + hidden_size
    i2h_w, i2h_b = linear(k1, hidden_size, comb)
    i2o_w, i2o_b = linear(k2, output_size, comb)
    o2o_w, o2o_b = linear(k3, output_size, hidden_size + output_size)
    return {"i2h_w": i2h_w, "i2h_b": i2h_b,
            "i2o_w": i2o_w, "i2o_b": i2o_b,
            "o2o_w": o2o_w, "o2o_b": o2o_b}


if __name__ == "__main__":
    B = 8            # batch (fills all 8 sublanes)
    CATEGORY = 8     # category_size
    INPUT = 16       # input_size (one-hot char)
    HIDDEN = 32      # hidden_size
    OUTPUT = 16      # output_size
    T = 16           # timesteps
    T_BLK = 8        # timesteps per grid step (amortises grid overhead)

    key = jax.random.PRNGKey(0)
    kp, kc, ki = jax.random.split(key, 3)

    params = _init_params(kp, CATEGORY, INPUT, HIDDEN, OUTPUT)
    category = jax.random.normal(kc, (B, CATEGORY), jnp.float32)
    inp_seq = jax.random.normal(ki, (T, B, INPUT), jnp.float32)
    hidden0 = jnp.zeros((B, HIDDEN), jnp.float32)   # init_hidden()

    # Step-by-step pure-JAX reference (original un-fused formulation).
    out1_ref, hid1_ref = _ref_forward(category, inp_seq[0], hidden0, params)
    out_ref_seq, h_ref = [], hidden0
    for t in range(T):
        o_r, h_ref = _ref_forward(category, inp_seq[t], h_ref, params)
        out_ref_seq.append(o_r)
    out_ref_seq = jnp.stack(out_ref_seq)

    # --- f32 path: tight correctness check ---
    prepped = prepare_params(params, CATEGORY, INPUT, HIDDEN, jnp.float32)

    out1, hid1 = rnn_forward(category, inp_seq[0], hidden0, prepped)
    jax.block_until_ready((out1, hid1))
    assert out1.shape == (B, OUTPUT) and hid1.shape == (B, HIDDEN)
    assert jnp.allclose(out1, out1_ref, atol=5e-4, rtol=1e-3)
    assert jnp.allclose(hid1, hid1_ref, atol=5e-4, rtol=1e-3)
    assert jnp.allclose(jnp.exp(out1).sum(axis=1), 1.0, atol=1e-4)

    out_seq, hid_T = rnn_forward_seq(category, inp_seq, hidden0, prepped,
                                     t_blk=T_BLK)
    jax.block_until_ready((out_seq, hid_T))
    assert out_seq.shape == (T, B, OUTPUT) and hid_T.shape == (B, HIDDEN)
    assert jnp.allclose(out_seq, out_ref_seq, atol=5e-4, rtol=1e-3)
    assert jnp.allclose(hid_T, h_ref, atol=5e-4, rtol=1e-3)
    assert jnp.allclose(jnp.exp(out_seq).sum(axis=-1), 1.0, atol=1e-4)

    # --- bf16-weight path (f32 accumulation): looser tolerance ---
    prepped_bf16 = prepare_params(params, CATEGORY, INPUT, HIDDEN, jnp.bfloat16)
    out_seq_bf, hid_T_bf = rnn_forward_seq(category, inp_seq, hidden0,
                                           prepped_bf16, t_blk=T_BLK)
    jax.block_until_ready((out_seq_bf, hid_T_bf))
    assert out_seq_bf.dtype == jnp.float32
    assert jnp.allclose(out_seq_bf, out_seq, atol=0.25)
    assert jnp.allclose(hid_T_bf, hid_T, atol=0.25)
    assert jnp.allclose(jnp.exp(out_seq_bf).sum(axis=-1), 1.0, atol=1e-3)

    print("KERNEL_OK")
</pallas_src>

<mosaic_0001>
module attributes {stable_mosaic.version = 11 : i64} {
  func.func @_rnn_step_kernel(%arg0: memref<8x8xf32, #tpu.memory_space<vmem>>, %arg1: memref<8x16xf32, #tpu.memory_space<vmem>>, %arg2: memref<8x32xf32, #tpu.memory_space<vmem>>, %arg3: memref<56x48xf32, #tpu.memory_space<vmem>>, %arg4: memref<1x48xf32, #tpu.memory_space<vmem>>, %arg5: memref<8x16xf32, #tpu.memory_space<vmem>>, %arg6: memref<8x32xf32, #tpu.memory_space<vmem>>, %arg7: memref<8x56xf32, #tpu.memory_space<vmem>>) attributes {dimension_semantics = [], scalar_prefetch = 0 : i64, scratch_operands = 1 : i64, tpu.core_type = #tpu.core_type<tc>} {
    %c0 = arith.constant 0 : index
    %c0_0 = arith.constant 0 : index
    %0 = vector.load %arg0[%c0, %c0_0] : memref<8x8xf32, #tpu.memory_space<vmem>>, vector<8x8xf32>
    %c0_1 = arith.constant 0 : index
    %c0_2 = arith.constant 0 : index
    %1 = vector.load %arg7[%c0_1, %c0_2] : memref<8x56xf32, #tpu.memory_space<vmem>>, vector<8x8xf32>
    tpu.vector_store %arg7[%c0_1, %c0_2], %0 {strides = array<i32>} : memref<8x56xf32, #tpu.memory_space<vmem>>, vector<8x8xf32>,
    %c0_3 = arith.constant 0 : index
    %c0_4 = arith.constant 0 : index
    %2 = vector.load %arg1[%c0_3, %c0_4] : memref<8x16xf32, #tpu.memory_space<vmem>>, vector<8x16xf32>
    %c0_5 = arith.constant 0 : index
    %c8 = arith.constant 8 : index
    %3 = vector.load %arg7[%c0_5, %c8] : memref<8x56xf32, #tpu.memory_space<vmem>>, vector<8x16xf32>
    tpu.vector_store %arg7[%c0_5, %c8], %2 {strides = array<i32>} : memref<8x56xf32, #tpu.memory_space<vmem>>, vector<8x16xf32>,
    %c0_6 = arith.constant 0 : index
    %c0_7 = arith.constant 0 : index
    %4 = vector.load %arg2[%c0_6, %c0_7] : memref<8x32xf32, #tpu.memory_space<vmem>>, vector<8x32xf32>
    %c0_8 = arith.constant 0 : index
    %c24 = arith.constant 24 : index
    %5 = vector.load %arg7[%c0_8, %c24] : memref<8x56xf32, #tpu.memory_space<vmem>>, vector<8x32xf32>
    tpu.vector_store %arg7[%c0_8, %c24], %4 {strides = array<i32>} : memref<8x56xf32, #tpu.memory_space<vmem>>, vector<8x32xf32>,
    %c0_9 = arith.constant 0 : index
    %c0_10 = arith.constant 0 : index
    %6 = vector.load %arg7[%c0_9, %c0_10] : memref<8x56xf32, #tpu.memory_space<vmem>>, vector<8x56xf32>
    %c0_11 = arith.constant 0 : index
    %c0_12 = arith.constant 0 : index
    %7 = vector.load %arg3[%c0_11, %c0_12] : memref<56x48xf32, #tpu.memory_space<vmem>>, vector<56x48xf32>
    %cst = arith.constant dense<0.000000e+00> : vector<8x48xf32>
    %8 = tpu.matmul %6, %7, %cst {dimension_numbers = #tpu.dot_dimension_numbers<[1], [0], [0], [1], [0, 0, 1, 1], [], []>} : vector<8x56xf32>, vector<56x48xf32>, vector<8x48xf32> -> vector<8x48xf32>
    %c0_13 = arith.constant 0 : index
    %c0_14 = arith.constant 0 : index
    %9 = vector.load %arg4[%c0_13, %c0_14] : memref<1x48xf32, #tpu.memory_space<vmem>>, vector<1x48xf32>
    %10 = vector.broadcast %9 : vector<1x48xf32> to vector<8x48xf32>
    %11 = arith.addf %8, %10 : vector<8x48xf32>
    %12 = vector.extract_strided_slice %11 {offsets = [0, 32], sizes = [8, 16], strides = [1, 1]} : vector<8x48xf32> to vector<8x16xf32>
    %cst_15 = arith.constant dense<0xFF800000> : vector<8xf32>
    %13 = vector.multi_reduction <maximumf>, %12, %cst_15 [1] : vector<8x16xf32> to vector<8xf32>
    %14 = vector.shape_cast %13 : vector<8xf32> to vector<8x1xf32>
    %15 = vector.broadcast %14 : vector<8x1xf32> to vector<8x16xf32>
    %16 = arith.subf %12, %15 : vector<8x16xf32>
    %17 = math.exp %16 : vector<8x16xf32>
    %cst_16 = arith.constant dense<0.000000e+00> : vector<8xf32>
    %18 = vector.multi_reduction <add>, %17, %cst_16 [1] : vector<8x16xf32> to vector<8xf32>
    %19 = vector.shape_cast %18 : vector<8xf32> to vector<8x1xf32>
    %20 = math.log %19 : vector<8x1xf32>
    %21 = vector.broadcast %20 : vector<8x1xf32> to vector<8x16xf32>
    %22 = arith.subf %16, %21 : vector<8x16xf32>
    %c0_17 = arith.constant 0 : index
    %c0_18 = arith.constant 0 : index
    %23 = vector.load %arg5[%c0_17, %c0_18] : memref<8x16xf32, #tpu.memory_space<vmem>>, vector<8x16xf32>
    tpu.vector_store %arg5[%c0_17, %c0_18], %22 {strides = array<i32>} : memref<8x16xf32, #tpu.memory_space<vmem>>, vector<8x16xf32>,
    %24 = vector.extract_strided_slice %11 {offsets = [0, 0], sizes = [8, 32], strides = [1, 1]} : vector<8x48xf32> to vector<8x32xf32>
    %c0_19 = arith.constant 0 : index
    %c0_20 = arith.constant 0 : index
    %25 = vector.load %arg6[%c0_19, %c0_20] : memref<8x32xf32, #tpu.memory_space<vmem>>, vector<8x32xf32>
    tpu.vector_store %arg6[%c0_19, %c0_20], %24 {strides = array<i32>} : memref<8x32xf32, #tpu.memory_space<vmem>>, vector<8x32xf32>,
    return
  }
}

</mosaic_0001>

<bundles_post_ra>
// kernel: tpu_custom_call.1
= control target key start
LH: loop header
LB: loop body
LE: loop exit
PB: predicated region body
PF: predicated region fallthrough
CT: control target
= control target key end

     0   :  { %12 = vsyncpa [#allocation4], 0  ;;  %s265_s25 = smov 8   ;;  %v266_v2 = vmov 0.0   ;;  %vm25_vm0 = vcmask 64512   ;;  %vm267_vm1 = vmmov 0   ;;  %s348_s0 = inlined_call_operand.vmem [shape: f32[8,8], index: 0, kind: input, shape index: {}]   ;;  %s349_s1 = inlined_call_operand.vmem [shape: f32[8,16], index: 1, kind: input, shape index: {}]   ;;  %s350_s2 = inlined_call_operand.vmem [shape: f32[8,32], index: 2, kind: input, shape index: {}]   ;;  %s351_s3 = inlined_call_operand.vmem [shape: f32[56,48], index: 3, kind: input, shape index: {}]   ;;  %s352_s4 = inlined_call_operand.vmem [shape: f32[1,48], index: 4, kind: input, shape index: {}]   ;;  %s353_s5 = inlined_call_operand.hbm [shape: f32[8,16], index: 5, kind: output, shape index: {0}]   ;;  %s354_s6 = inlined_call_operand.hbm [shape: f32[8,32], index: 6, kind: output, shape index: {1}]  }
   0x1   :  { %v27_v0 = vld [vmem:[%s349_s1] sm:$0xff]  ;;  %v48_v1 = vld [vmem:[%s351_s3 + $0x30] sm:$0xff]  ;;  %193 = vmatprep.subr.mxu0 %v266_v2  ;;  %v47_v4 = vld [vmem:[%s351_s3 + $0x28] sm:$0xff]  ;;  %207 = vmatprep.mubr.msk.f32.mxu0 %vm267_vm1, %v266_v2 }
   0x2   :  { %29 = vrot.lane.b32.xlu0 %v27_v0, %s265_s25  ;;  %v24_v3 = vld [vmem:[%s348_s0] sm:$0xff]  ;;  %194 = vmatpush3.msra.mxu0 %v48_v1 }
   0x3   :  { %v34_v5 = vld [vmem:[%s350_s2] sm:$0xff]  ;;  %26 = vst.msk [vmem:[#allocation2] sm:$0xff] %vm25_vm0, %v24_v3  ;;  %195 = vmatprep.subr.mxu0 %v266_v2 }
   0x4   :  { %v46_v6 = vld [vmem:[%s351_s3 + $0x20] sm:$0xff] }
   0x5   :  { %13 = vsyncpa [#allocation6], 0  ;;  %196 = vmatpush3.msra.mxu0 %v47_v4  ;;  %s268_s0 = smov 24   ;;  %v45_v7 = vld [vmem:[%s351_s3 + $0x18] sm:$0xff]  ;;  %v44_v8 = vld [vmem:[%s351_s3 + $0x10] sm:$0xff]  ;;  %vm32_vm2 = vcmask 195648  }
   0x6   :  { %36 = vrot.lane.b32.xlu0 %v34_v5, %s268_s0  ;;  %197 = vmatprep.subr.mxu0 %v266_v2  ;;  %v43_v9 = vld [vmem:[%s351_s3 + $0x8] sm:$0xff]  ;;  %v42_v10 = vld [vmem:[%s351_s3] sm:$0xff]  ;;  %vm39_vm3 = vcmask 457920   ;;  %vm56_vm4 = vcmask 457728   ;;  %vm130_vm5 = vcmask 392448   ;;  %vm153_vm6 = vcmask 261120  }
   0x7   :  { %198 = vmatpush3.msra.mxu0 %v46_v6  ;;  %v183_v14 = vld [vmem:[%s352_s4] ss:$0 sm:$0xff]  ;;  %s269_s3 = smov 96   ;;  %vm141_vm7 = vcmask 130048   ;;  %s270_s4 = smov [#allocation5]  }
   0x8   :  { %199 = vmatprep.subr.mxu0 %v266_v2  ;;  %s171_s18 = sshll.u32 %s270_s4, 4  ;;  %s172_s18 = int_to_ptr.vmem [resolvable:$true] %s171_s18 }
   0x9   :  { %200 = vmatpush3.msra.mxu0 %v45_v7  ;;  %s221_s19 = scalar_lea.vmem %s172_s18, 128  ;;  %p226_p1 = scmp.lt.s32.totalorder %s172_s18, %s172_s18 }
   0xa   :  { %201 = vmatprep.subr.mxu0 %v266_v2  ;;  %p222_p0 = scmp.ne.s32.totalorder %s172_s18, %s221_s19  ;;  %p227_p2 = scmp.lt.s32.totalorder %s221_s19, %s221_s19 }
   0xb   :  { %202 = vmatpush3.msra.mxu0 %v44_v8 }
   0xc   :  { %203 = vmatprep.subr.mxu0 %v266_v2  ;;  %p228_p3 = por %p227_p2, %p226_p1 }
   0xd   :  { %204 = vmatpush3.msra.mxu0 %v43_v9 }
   0xe   :  { %205 = vmatprep.subr.mxu0 %v266_v2  ;;  %p229_p4 = pnand %p228_p3, %p222_p0 }
   0xf   :  { %206 = vmatpush3.msra.mxu0 %v42_v10 }
  0x74   :  { %v30_v11 = vpop.permute.xlu0 %29 }
  0x75   :  { %33 = vst.msk [vmem:[#allocation2] sm:$0xff] %vm32_vm2, %v30_v11 }
  0x78   :  { %v37_v12 = vpop.permute.xlu0 %36 }
  0x79   :  { %40 = vst.msk [vmem:[#allocation2] sm:$0xff] %vm39_vm3, %v37_v12 }
  0x80   :  { %v41_v13 = vld [vmem:[#allocation2] sm:$0xff] }
  0x81   :  { %208 = vmatmul.mubr.msk.f32.vlgmr.msra.gmra.mxu0 %vm56_vm4, %v41_v13 }
 0x141   :  { %v126_v15 = vpop.f32.mrf.mxu0 }
 0x142   :  { %v127_v16 = vadd.f32 %v183_v14, %v126_v15 }
 0x143   :  { %v209_v17 = vpop.f32.mrf.mxu0 }
 0x144   :  { %v131_v18 = vsel %vm130_vm5, %v127_v16, -inf  ;;  %154 = vst.msk [vmem:[#allocation5] sm:$0xff] %vm153_vm6, %v127_v16 }
 0x145   :  { %132 = vmax.xlane.f32.xlu1 %v131_v18 }
 0x1ce   :  { %v133_v19 = vpop.xlane.xlu1 %132 }
 0x1cf   :  { %v134_v20 = vsub.f32 %v127_v16, %v133_v19 }
 0x1d1   :  { %v135_v21 = vmul.f32 1.442695, %v134_v20 }
 0x1d3   :  { %217 = vpow2.f32 %v135_v21 }
 0x1e0   :  { %v218_v22 = vpop.eup %217 }
 0x1e1   :  { %138 = vrot.lane.b32.xlu1 %v218_v22, %s269_s3 }
 0x253   :  { %v139_v23 = vpop.permute.xlu1 %138 }
 0x254   :  { %v142_v24 = vsel %vm141_vm7, %v139_v23, 0.0 }
 0x255   :  { %143 = vadd.xlane.f32.xlu0 %v142_v24 }
 0x2de   :  { %v144_v25 = vpop.xlane.xlu0 %143 }
 0x2df   :  { %219 = vlog2.f32 %v144_v25 }
 0x2e0   :  { %232 = shalt.err (!%p229_p4)
}
 0x2e1   :  { %174 = dma.vmem_to_hbm [thread:$0]  %s172_s18, 128, %s354_s6, [#allocation6]  }
 0x2e2   :  { %s271_s22 = smov [#allocation3]  }
 0x2e3   :  { %s161_s23 = sshll.u32 %s271_s22, 4  ;;  %s162_s23 = int_to_ptr.vmem [resolvable:$true] %s161_s23 }
 0x2e4   :  { %s241_s24 = scalar_lea.vmem %s162_s23, 128  ;;  %p246_p6 = scmp.lt.s32.totalorder %s162_s23, %s162_s23 }
 0x2e5   :  { %p242_p5 = scmp.ne.s32.totalorder %s162_s23, %s241_s24  ;;  %p247_p7 = scmp.lt.s32.totalorder %s241_s24, %s241_s24 }
 0x2e7   :  { %p248_p8 = por %p247_p7, %p246_p6 }
 0x2e9   :  { %p249_p9 = pnand %p248_p8, %p242_p5 }
 0x2ec   :  { %v220_v26 = vpop.eup %219 }
 0x2ed   :  { %v146_v27 = vmul.f32 0.6931472, %v220_v26 }
 0x2ef   :  { %v147_v28 = vsub.f32 %v134_v20, %v146_v27 }
 0x2f1   :  { %149 = vrot.lane.b32.xlu1 %v147_v28, %s269_s3 }
 0x363   :  { %v150_v29 = vpop.permute.xlu1 %149 }
 0x364   :  { %152 = vst.msk [vmem:[#allocation3] sm:$0xff] %vm141_vm7, %v150_v29 }
 0x365   :  { %252 = shalt.err (!%p249_p9)
}
 0x366   :  { %164 = dma.vmem_to_hbm [thread:$0]  %s162_s23, 128, %s353_s5, [#allocation4]  }
 0x367   :  { %261 = dma.done.wait [#allocation4], 128  }
 0x368   :  { %262 = vsyncadd [#allocation4], 4294967168 }
 0x369   :  { %263 = dma.done.wait [#allocation6], 128  }
 0x36a   :  { %264 = vsyncadd [#allocation6], 4294967168 }
 0x36b   :  { %181 = vsyncpa [#allocation4], 1 }
 0x36c   :  { %182 = vsyncpa [#allocation6], 1 }

</bundles_post_ra>
